<compile_context>
chip_gen: v7x
topology: tpu7x:2x2x1
jax: 0.10.0
libtpu: 0.0.40
codegen_flags: <defaults>
</compile_context>

<pallas_src>
import jax
import jax.numpy as jnp
from jax.experimental import pallas as pl
from jax.experimental.pallas import tpu as pltpu

HIDDEN = 128


def _round_up(x, m):
    return ((x + m - 1) // m) * m


def ae_kernel(x_ref,
              w1_ref, b1_ref,
              w2_ref, b2_ref,
              w3_ref, b3_ref,
              w4_ref, b4_ref,
              o_ref):
    """Fused 4-layer MLP (Linear + ReLU x 4) on one [tb, D] batch tile.

    Matmuls run in bf16 on the MXU with f32 accumulation; bias add and ReLU
    are done in f32, intermediate activations re-cast to bf16.  The input is
    cast f32 -> bf16 here (no separate XLA cast pass over HBM).
    """
    h = x_ref[...].astype(jnp.bfloat16)                       # [tb, D] bf16

    # encoder_hidden_layer + relu
    h = jnp.dot(h, w1_ref[...], preferred_element_type=jnp.float32) + b1_ref[...]
    h = jnp.maximum(h, 0.0).astype(jnp.bfloat16)

    # encoder_output_layer + relu
    h = jnp.dot(h, w2_ref[...], preferred_element_type=jnp.float32) + b2_ref[...]
    h = jnp.maximum(h, 0.0).astype(jnp.bfloat16)

    # decoder_hidden_layer + relu
    h = jnp.dot(h, w3_ref[...], preferred_element_type=jnp.float32) + b3_ref[...]
    h = jnp.maximum(h, 0.0).astype(jnp.bfloat16)

    # decoder_output_layer + relu
    h = jnp.dot(h, w4_ref[...], preferred_element_type=jnp.float32) + b4_ref[...]
    o_ref[...] = jnp.maximum(h, 0.0).astype(o_ref.dtype)


def _choose_batch_tile(B):
    """Batch tile: multiple of 16 (bf16 sublane packing), up to 512 rows so
    each grid step moves a large DMA; batches <= 512 run as one step."""
    return min(512, _round_up(max(B, 1), 16))


def ae_forward(x, params, *, tb=None, out_dtype=None):
    """x: [B, D] float32.  params: dict of (w, b) with w as [in, out].

    Params may be pre-cast with prepare_params(); astype below is then a
    no-op.  Output dtype defaults to x.dtype (f32 for PyTorch parity); pass
    out_dtype=jnp.bfloat16 to halve writeback traffic if acceptable downstream.
    """
    B, D = x.shape
    if out_dtype is None:
        out_dtype = x.dtype
    if tb is None:
        tb = _choose_batch_tile(B)
    grid = (pl.cdiv(B, tb),)

    # bf16 weights for the MXU; biases f32 (added post-accumulation).
    w1 = params["w1"].astype(jnp.bfloat16); b1 = params["b1"].astype(jnp.float32)
    w2 = params["w2"].astype(jnp.bfloat16); b2 = params["b2"].astype(jnp.float32)
    w3 = params["w3"].astype(jnp.bfloat16); b3 = params["b3"].astype(jnp.float32)
    w4 = params["w4"].astype(jnp.bfloat16); b4 = params["b4"].astype(jnp.float32)

    weight_bytes = sum(int(a.size) * a.dtype.itemsize
                       for a in (w1, b1, w2, b2, w3, b3, w4, b4))

    # Advisory cost estimate for XLA's scheduler (f32 input read + out write +
    # weights/biases; this kernel is HBM/overhead-bound).
    flops = 2 * B * (D * HIDDEN + HIDDEN * HIDDEN + HIDDEN * HIDDEN + HIDDEN * D)
    bytes_accessed = (B * D * jnp.dtype(x.dtype).itemsize
                      + B * D * jnp.dtype(out_dtype).itemsize
                      + weight_bytes)
    cost = pl.CostEstimate(flops=int(flops), transcendentals=0,
                           bytes_accessed=int(bytes_accessed))

    # VMEM budget: double-buffered x/out tiles + weights + activation scratch,
    # with 2x margin.  No 32 MiB floor (actual footprint is a few MiB).
    x_tile_bytes = tb * D * jnp.dtype(x.dtype).itemsize
    o_tile_bytes = tb * D * jnp.dtype(out_dtype).itemsize
    act_bytes = 4 * tb * HIDDEN * 4            # generous f32 intermediate slack
    vmem_needed = 2 * (x_tile_bytes + o_tile_bytes) + 2 * weight_bytes + act_bytes
    vmem_limit = max(int(vmem_needed * 2), 4 * 1024 * 1024)

    def weight_spec(shape):
        return pl.BlockSpec(shape, lambda i: (0, 0))   # grid-invariant, VMEM-resident

    out = pl.pallas_call(
        ae_kernel,
        out_shape=jax.ShapeDtypeStruct((B, D), out_dtype),
        grid_spec=pltpu.PrefetchScalarGridSpec(
            num_scalar_prefetch=0,
            grid=grid,
            in_specs=[
                pl.BlockSpec((tb, D), lambda i: (i, 0)),                  # x tile (f32)
                weight_spec((D, HIDDEN)), weight_spec((1, HIDDEN)),       # layer 1
                weight_spec((HIDDEN, HIDDEN)), weight_spec((1, HIDDEN)),  # layer 2
                weight_spec((HIDDEN, HIDDEN)), weight_spec((1, HIDDEN)),  # layer 3
                weight_spec((HIDDEN, D)), weight_spec((1, D)),            # layer 4
            ],
            out_specs=pl.BlockSpec((tb, D), lambda i: (i, 0)),
        ),
        compiler_params=pltpu.CompilerParams(
            dimension_semantics=("parallel",),
            vmem_limit_bytes=vmem_limit),
        cost_estimate=cost,
    )(x, w1, b1, w2, b2, w3, b3, w4, b4)

    return out


def init_params(key, input_shape):
    """Deterministic init mimicking PyTorch Linear default U(-1/sqrt(in), 1/sqrt(in)).
    Weights are stored as [in, out] (transposed vs PyTorch's [out, in])."""
    dims = [(input_shape, HIDDEN), (HIDDEN, HIDDEN),
            (HIDDEN, HIDDEN), (HIDDEN, input_shape)]
    params = {}
    keys = jax.random.split(key, 2 * len(dims))
    for idx, (fan_in, fan_out) in enumerate(dims):
        bound = 1.0 / jnp.sqrt(fan_in)
        w = jax.random.uniform(keys[2 * idx], (fan_in, fan_out),
                               minval=-bound, maxval=bound, dtype=jnp.float32)
        b = jax.random.uniform(keys[2 * idx + 1], (1, fan_out),
                               minval=-bound, maxval=bound, dtype=jnp.float32)
        params[f"w{idx + 1}"] = w
        params[f"b{idx + 1}"] = b
    return params


def prepare_params(params):
    """One-time cast of weights to bf16 / biases to f32 so ae_forward does no
    per-call weight conversion work."""
    prepared = {}
    for i in range(1, 5):
        prepared[f"w{i}"] = params[f"w{i}"].astype(jnp.bfloat16)
        prepared[f"b{i}"] = params[f"b{i}"].astype(jnp.float32)
    return prepared


def ae_reference_f32(x, params):
    """Pure-JAX f32 reference of the module's forward pass."""
    h = jnp.maximum(x @ params["w1"] + params["b1"], 0.0)
    h = jnp.maximum(h @ params["w2"] + params["b2"], 0.0)
    h = jnp.maximum(h @ params["w3"] + params["b3"], 0.0)
    return jnp.maximum(h @ params["w4"] + params["b4"], 0.0)


def ae_reference_bf16(x, params):
    """Reference mirroring the kernel's bf16-matmul / f32-accumulate recipe."""
    def layer(h, w, b):
        y = jnp.dot(h.astype(jnp.bfloat16), w.astype(jnp.bfloat16),
                    preferred_element_type=jnp.float32) + b
        return jnp.maximum(y, 0.0)
    h = layer(x, params["w1"], params["b1"])
    h = layer(h, params["w2"], params["b2"])
    h = layer(h, params["w3"], params["b3"])
    return layer(h, params["w4"], params["b4"])


if __name__ == "__main__":
    key = jax.random.PRNGKey(0)
    k_params, k_x = jax.random.split(key)

    INPUT_SHAPE = 64  # kwargs['input_shape'] for the module (small test size)
    params = init_params(k_params, INPUT_SHAPE)
    dev_params = prepare_params(params)   # bf16 weights / f32 biases, cast once

    # (B, tb_override): exact tile, partial (masked) tile, and multi-step grid.
    cases = [(32, None), (20, None), (40, 16)]
    for B, tb in cases:
        x = jax.random.normal(jax.random.fold_in(k_x, B),
                              (B, INPUT_SHAPE), dtype=jnp.float32)

        out = jax.block_until_ready(ae_forward(x, dev_params, tb=tb))
        assert out.shape == (B, INPUT_SHAPE)

        ref_bf16 = ae_reference_bf16(x, params)
        ref_f32 = ae_reference_f32(x, params)
        assert jnp.allclose(out, ref_bf16, atol=5e-3, rtol=5e-3), \
            f"B={B}: mismatch vs bf16-matmul reference"
        assert jnp.allclose(out, ref_f32, atol=1e-1, rtol=1e-1), \
            f"B={B}: mismatch vs f32 reference beyond bf16 tolerance"

    print("KERNEL_OK")
</pallas_src>

<mosaic_0001>
module attributes {stable_mosaic.version = 11 : i64} {
  func.func @ae_kernel(%arg0: i32, %arg1: memref<32x64xf32, #tpu.memory_space<vmem>>, %arg2: memref<64x128xbf16, #tpu.memory_space<vmem>>, %arg3: memref<1x128xf32, #tpu.memory_space<vmem>>, %arg4: memref<128x128xbf16, #tpu.memory_space<vmem>>, %arg5: memref<1x128xf32, #tpu.memory_space<vmem>>, %arg6: memref<128x128xbf16, #tpu.memory_space<vmem>>, %arg7: memref<1x128xf32, #tpu.memory_space<vmem>>, %arg8: memref<128x64xbf16, #tpu.memory_space<vmem>>, %arg9: memref<1x64xf32, #tpu.memory_space<vmem>>, %arg10: memref<32x64xf32, #tpu.memory_space<vmem>>) attributes {dimension_semantics = [#tpu.dimension_semantics<parallel>], iteration_bounds = array<i64: 1>, scalar_prefetch = 0 : i64, scratch_operands = 0 : i64, tpu.core_type = #tpu.core_type<tc>, window_params = [{transform_indices = @transform_0, window_bounds = array<i64: 32, 64>}, {pipeline_mode = #tpu.pipeline_mode<synchronous>, transform_indices = @transform_1, window_bounds = array<i64: 64, 128>}, {pipeline_mode = #tpu.pipeline_mode<synchronous>, transform_indices = @transform_2, window_bounds = array<i64: 1, 128>}, {pipeline_mode = #tpu.pipeline_mode<synchronous>, transform_indices = @transform_3, window_bounds = array<i64: 128, 128>}, {pipeline_mode = #tpu.pipeline_mode<synchronous>, transform_indices = @transform_4, window_bounds = array<i64: 1, 128>}, {pipeline_mode = #tpu.pipeline_mode<synchronous>, transform_indices = @transform_5, window_bounds = array<i64: 128, 128>}, {pipeline_mode = #tpu.pipeline_mode<synchronous>, transform_indices = @transform_6, window_bounds = array<i64: 1, 128>}, {pipeline_mode = #tpu.pipeline_mode<synchronous>, transform_indices = @transform_7, window_bounds = array<i64: 128, 64>}, {pipeline_mode = #tpu.pipeline_mode<synchronous>, transform_indices = @transform_8, window_bounds = array<i64: 1, 64>}, {transform_indices = @transform_9, window_bounds = array<i64: 32, 64>}]} {
    %c0 = arith.constant 0 : index
    %c0_0 = arith.constant 0 : index
    %0 = vector.load %arg1[%c0, %c0_0] : memref<32x64xf32, #tpu.memory_space<vmem>>, vector<32x64xf32>
    %1 = arith.truncf %0 : vector<32x64xf32> to vector<32x64xbf16>
    %c0_1 = arith.constant 0 : index
    %c0_2 = arith.constant 0 : index
    %2 = vector.load %arg2[%c0_1, %c0_2] : memref<64x128xbf16, #tpu.memory_space<vmem>>, vector<64x128xbf16>
    %cst = arith.constant dense<0.000000e+00> : vector<32x128xf32>
    %3 = tpu.matmul %1, %2, %cst {dimension_numbers = #tpu.dot_dimension_numbers<[1], [0], [0], [1], [0, 0, 1, 1], [], []>} : vector<32x64xbf16>, vector<64x128xbf16>, vector<32x128xf32> -> vector<32x128xf32>
    %c0_3 = arith.constant 0 : index
    %c0_4 = arith.constant 0 : index
    %4 = vector.load %arg3[%c0_3, %c0_4] : memref<1x128xf32, #tpu.memory_space<vmem>>, vector<1x128xf32>
    %5 = vector.broadcast %4 : vector<1x128xf32> to vector<32x128xf32>
    %6 = arith.addf %3, %5 : vector<32x128xf32>
    %cst_5 = arith.constant 0.000000e+00 : f32
    %7 = vector.broadcast %cst_5 : f32 to vector<32x128xf32>
    %8 = arith.maximumf %6, %7 : vector<32x128xf32>
    %9 = arith.truncf %8 : vector<32x128xf32> to vector<32x128xbf16>
    %c0_6 = arith.constant 0 : index
    %c0_7 = arith.constant 0 : index
    %10 = vector.load %arg4[%c0_6, %c0_7] : memref<128x128xbf16, #tpu.memory_space<vmem>>, vector<128x128xbf16>
    %cst_8 = arith.constant dense<0.000000e+00> : vector<32x128xf32>
    %11 = tpu.matmul %9, %10, %cst_8 {dimension_numbers = #tpu.dot_dimension_numbers<[1], [0], [0], [1], [0, 0, 1, 1], [], []>} : vector<32x128xbf16>, vector<128x128xbf16>, vector<32x128xf32> -> vector<32x128xf32>
    %c0_9 = arith.constant 0 : index
    %c0_10 = arith.constant 0 : index
    %12 = vector.load %arg5[%c0_9, %c0_10] : memref<1x128xf32, #tpu.memory_space<vmem>>, vector<1x128xf32>
    %13 = vector.broadcast %12 : vector<1x128xf32> to vector<32x128xf32>
    %14 = arith.addf %11, %13 : vector<32x128xf32>
    %cst_11 = arith.constant 0.000000e+00 : f32
    %15 = vector.broadcast %cst_11 : f32 to vector<32x128xf32>
    %16 = arith.maximumf %14, %15 : vector<32x128xf32>
    %17 = arith.truncf %16 : vector<32x128xf32> to vector<32x128xbf16>
    %c0_12 = arith.constant 0 : index
    %c0_13 = arith.constant 0 : index
    %18 = vector.load %arg6[%c0_12, %c0_13] : memref<128x128xbf16, #tpu.memory_space<vmem>>, vector<128x128xbf16>
    %cst_14 = arith.constant dense<0.000000e+00> : vector<32x128xf32>
    %19 = tpu.matmul %17, %18, %cst_14 {dimension_numbers = #tpu.dot_dimension_numbers<[1], [0], [0], [1], [0, 0, 1, 1], [], []>} : vector<32x128xbf16>, vector<128x128xbf16>, vector<32x128xf32> -> vector<32x128xf32>
    %c0_15 = arith.constant 0 : index
    %c0_16 = arith.constant 0 : index
    %20 = vector.load %arg7[%c0_15, %c0_16] : memref<1x128xf32, #tpu.memory_space<vmem>>, vector<1x128xf32>
    %21 = vector.broadcast %20 : vector<1x128xf32> to vector<32x128xf32>
    %22 = arith.addf %19, %21 : vector<32x128xf32>
    %cst_17 = arith.constant 0.000000e+00 : f32
    %23 = vector.broadcast %cst_17 : f32 to vector<32x128xf32>
    %24 = arith.maximumf %22, %23 : vector<32x128xf32>
    %25 = arith.truncf %24 : vector<32x128xf32> to vector<32x128xbf16>
    %c0_18 = arith.constant 0 : index
    %c0_19 = arith.constant 0 : index
    %26 = vector.load %arg8[%c0_18, %c0_19] : memref<128x64xbf16, #tpu.memory_space<vmem>>, vector<128x64xbf16>
    %cst_20 = arith.constant dense<0.000000e+00> : vector<32x64xf32>
    %27 = tpu.matmul %25, %26, %cst_20 {dimension_numbers = #tpu.dot_dimension_numbers<[1], [0], [0], [1], [0, 0, 1, 1], [], []>} : vector<32x128xbf16>, vector<128x64xbf16>, vector<32x64xf32> -> vector<32x64xf32>
    %c0_21 = arith.constant 0 : index
    %c0_22 = arith.constant 0 : index
    %28 = vector.load %arg9[%c0_21, %c0_22] : memref<1x64xf32, #tpu.memory_space<vmem>>, vector<1x64xf32>
    %29 = vector.broadcast %28 : vector<1x64xf32> to vector<32x64xf32>
    %30 = arith.addf %27, %29 : vector<32x64xf32>
    %cst_23 = arith.constant 0.000000e+00 : f32
    %31 = vector.broadcast %cst_23 : f32 to vector<32x64xf32>
    %32 = arith.maximumf %30, %31 : vector<32x64xf32>
    %c0_24 = arith.constant 0 : index
    %c0_25 = arith.constant 0 : index
    %33 = vector.load %arg10[%c0_24, %c0_25] : memref<32x64xf32, #tpu.memory_space<vmem>>, vector<32x64xf32>
    tpu.vector_store %arg10[%c0_24, %c0_25], %32 {strides = array<i32>} : memref<32x64xf32, #tpu.memory_space<vmem>>, vector<32x64xf32>,
    return
  }
  func.func @transform_0(%arg0: i32) -> (i32, i32) {
    %c0_i32 = arith.constant 0 : i32
    %c0_i32_0 = arith.constant 0 : i32
    return %arg0, %c0_i32 : i32, i32
  }
  func.func @transform_1(%arg0: i32) -> (i32, i32) {
    %c0_i32 = arith.constant 0 : i32
    %c0_i32_0 = arith.constant 0 : i32
    %c0_i32_1 = arith.constant 0 : i32
    return %c0_i32, %c0_i32_0 : i32, i32
  }
  func.func @transform_2(%arg0: i32) -> (i32, i32) {
    %c0_i32 = arith.constant 0 : i32
    %c0_i32_0 = arith.constant 0 : i32
    %c0_i32_1 = arith.constant 0 : i32
    return %c0_i32, %c0_i32_0 : i32, i32
  }
  func.func @transform_3(%arg0: i32) -> (i32, i32) {
    %c0_i32 = arith.constant 0 : i32
    %c0_i32_0 = arith.constant 0 : i32
    %c0_i32_1 = arith.constant 0 : i32
    return %c0_i32, %c0_i32_0 : i32, i32
  }
  func.func @transform_4(%arg0: i32) -> (i32, i32) {
    %c0_i32 = arith.constant 0 : i32
    %c0_i32_0 = arith.constant 0 : i32
    %c0_i32_1 = arith.constant 0 : i32
    return %c0_i32, %c0_i32_0 : i32, i32
  }
  func.func @transform_5(%arg0: i32) -> (i32, i32) {
    %c0_i32 = arith.constant 0 : i32
    %c0_i32_0 = arith.constant 0 : i32
    %c0_i32_1 = arith.constant 0 : i32
    return %c0_i32, %c0_i32_0 : i32, i32
  }
  func.func @transform_6(%arg0: i32) -> (i32, i32) {
    %c0_i32 = arith.constant 0 : i32
    %c0_i32_0 = arith.constant 0 : i32
    %c0_i32_1 = arith.constant 0 : i32
    return %c0_i32, %c0_i32_0 : i32, i32
  }
  func.func @transform_7(%arg0: i32) -> (i32, i32) {
    %c0_i32 = arith.constant 0 : i32
    %c0_i32_0 = arith.constant 0 : i32
    %c0_i32_1 = arith.constant 0 : i32
    return %c0_i32, %c0_i32_0 : i32, i32
  }
  func.func @transform_8(%arg0: i32) -> (i32, i32) {
    %c0_i32 = arith.constant 0 : i32
    %c0_i32_0 = arith.constant 0 : i32
    %c0_i32_1 = arith.constant 0 : i32
    return %c0_i32, %c0_i32_0 : i32, i32
  }
  func.func @transform_9(%arg0: i32) -> (i32, i32) {
    %c0_i32 = arith.constant 0 : i32
    %c0_i32_0 = arith.constant 0 : i32
    return %arg0, %c0_i32 : i32, i32
  }
}

</mosaic_0001>

<bundles_post_ra>
// kernel: tpu_custom_call.1
= control target key start
LH: loop header
LB: loop body
LE: loop exit
PB: predicated region body
PF: predicated region fallthrough
CT: control target
= control target key end

     0   :  { %14 = vsyncpa [#allocation3], 0  ;;  %s987_s0 = inlined_call_operand.vmem [shape: f32[32,64], index: 0, kind: input, shape index: {}]   ;;  %s988_s1 = inlined_call_operand.hbm [shape: bf16[64,128], index: 1, kind: input, shape index: {}]   ;;  %s989_s2 = inlined_call_operand.vmem [shape: f32[1,128], index: 2, kind: input, shape index: {}]   ;;  %s990_s3 = inlined_call_operand.vmem [shape: bf16[128,128], index: 3, kind: input, shape index: {}]   ;;  %s991_s4 = inlined_call_operand.vmem [shape: f32[1,128], index: 4, kind: input, shape index: {}]   ;;  %s992_s5 = inlined_call_operand.hbm [shape: bf16[128,128], index: 5, kind: input, shape index: {}]   ;;  %s993_s6 = inlined_call_operand.vmem [shape: f32[1,128], index: 6, kind: input, shape index: {}]   ;;  %s994_s7 = inlined_call_operand.vmem [shape: bf16[128,64], index: 7, kind: input, shape index: {}]   ;;  %s995_s8 = inlined_call_operand.vmem [shape: f32[1,64], index: 8, kind: input, shape index: {}]   ;;  %s996_s9 = inlined_call_operand.hbm [shape: f32[32,64], index: 9, kind: output, shape index: {}]  }
   0x1   :  { %15 = vsyncpa [#allocation6], 0 }
   0x2   :  { %16 = vsyncpa [#allocation4], 0  ;;  %s816_s30 = smov [#allocation2]   ;;  %s744_s13 = scalar_lea.hbm %s988_s1, 512 }
   0x3   :  { %s24_s10 = sshll.u32 %s816_s30, 4  ;;  %p745_p0 = scmp.ne.s32.totalorder %s988_s1, %s744_s13  ;;  %s25_s10 = int_to_ptr.vmem [resolvable:$true] %s24_s10 }
   0x4   :  { %p748_p1 = scmp.lt.u32.totalorder %s744_s13, %s988_s1 }
   0x6   :  { %p750_p2 = pnand %p748_p1, %p745_p0 }
   0x8   :  { %753 = shalt.err (!%p750_p2)
}
   0x9   :  { %s754_s18 = scalar_lea.vmem %s25_s10, 512  ;;  %p759_p4 = scmp.lt.s32.totalorder %s25_s10, %s25_s10 }
   0xa   :  { %p755_p3 = scmp.ne.s32.totalorder %s25_s10, %s754_s18  ;;  %p760_p5 = scmp.lt.s32.totalorder %s754_s18, %s754_s18 }
   0xc   :  { %p761_p6 = por %p760_p5, %p759_p4 }
   0xe   :  { %p762_p7 = pnand %p761_p6, %p755_p3 }
  0x10   :  { %765 = shalt.err (!%p762_p7)
}
  0x11   :  { %s817_s19 = smov 64   ;;  %s818_s20 = smov 4  }
  0x12   :  { %30 = dma.hbm_to_vmem [thread:$0]  %s988_s1, 512, %s25_s10, [#allocation3], %s817_s19, %s817_s19, %s818_s20  }
  0x13   :  { %s819_s23 = smov [#allocation5]   ;;  %s766_s27 = scalar_lea.hbm %s992_s5, 1024 }
  0x14   :  { %s42_s24 = sshll.u32 %s819_s23, 4  ;;  %p767_p8 = scmp.ne.s32.totalorder %s992_s5, %s766_s27  ;;  %s43_s24 = int_to_ptr.vmem [resolvable:$true] %s42_s24 }
  0x15   :  { %p770_p9 = scmp.lt.u32.totalorder %s766_s27, %s992_s5 }
  0x17   :  { %p772_p10 = pnand %p770_p9, %p767_p8 }
  0x19   :  { %775 = shalt.err (!%p772_p10)
}
  0x1a   :  { %s776_s12 = scalar_lea.vmem %s43_s24, 1024  ;;  %p781_p12 = scmp.lt.s32.totalorder %s43_s24, %s43_s24 }
  0x1b   :  { %p777_p11 = scmp.ne.s32.totalorder %s43_s24, %s776_s12  ;;  %p782_p13 = scmp.lt.s32.totalorder %s776_s12, %s776_s12 }
  0x1d   :  { %p783_p0 = por %p782_p13, %p781_p12 }
  0x1f   :  { %p784_p1 = pnand %p783_p0, %p777_p11 }
  0x21   :  { %787 = shalt.err (!%p784_p1)
}
  0x22   :  { %48 = dma.hbm_to_vmem [thread:$0]  %s992_s5, 1024, %s43_s24, [#allocation6], %s817_s19, %s817_s19, %s818_s20  }
  0x23   :  { %810 = dma.done.wait [#allocation3], 512  }
  0x24   :  { %811 = vsyncadd [#allocation3], 4294966784 }
  0x25   :  { %812 = dma.done.wait [#allocation6], 1024  }
  0x26   :  { %813 = vsyncadd [#allocation6], 4294966272  ;;  %v716_v0 = vld [vmem:[#allocation2] sm:$0xff]   ;;  %v717_v1 = vld [vmem:[#allocation2 + $0x8] sm:$0xff]   ;;  %vm107_vm0 = vcmask 523264  }
  0x27   :  { %637 = vmatprep.subr.bf16.mxu0 %v716_v0  ;;  %v718_v2 = vld [vmem:[#allocation2 + $0x10] sm:$0xff]   ;;  %v62_v3 = vld [vmem:[%s987_s0] sm:$0xff]  ;;  %v63_v4 = vld [vmem:[%s987_s0 + $0x8] sm:$0xff] }
  0x28   :  { %638 = vmatpush3.bf16.msra.mxu0 %v716_v0  ;;  %v66_v5 = vpack.c.bf16 %v63_v4, %v62_v3  ;;  %v720_v6 = vld [vmem:[%s990_s3] sm:$0xff]   ;;  %v721_v7 = vld [vmem:[%s990_s3 + $0x8] sm:$0xff]   ;;  %v719_v8 = vld [vmem:[#allocation2 + $0x18] sm:$0xff]  }
  0x29   :  { %639 = vmatprep.subr.bf16.mxu0 %v717_v1  ;;  %649 = vmatprep.subr.bf16.mxu1 %v720_v6  ;;  %v64_v9 = vld [vmem:[%s987_s0 + $0x10] sm:$0xff]  ;;  %v65_v11 = vld [vmem:[%s987_s0 + $0x18] sm:$0xff]  ;;  %v724_v14 = vld [vmem:[%s990_s3 + $0x20] sm:$0xff]  }
  0x2a   :  { %645 = vmatprep.mubr.msk.bf16.mxu0 %vm107_vm0, %v66_v5  ;;  %650 = vmatpush3.bf16.msra.mxu1 %v720_v6  ;;  %v722_v10 = vld [vmem:[%s990_s3 + $0x10] sm:$0xff]   ;;  %v723_v12 = vld [vmem:[%s990_s3 + $0x18] sm:$0xff]   ;;  %v67_v13 = vpack.c.bf16 %v65_v11, %v64_v9  ;;  %v725_v15 = vld [vmem:[%s990_s3 + $0x28] sm:$0xff]  }
  0x2b   :  { %651 = vmatprep.subr.bf16.mxu1 %v721_v7  ;;  %v726_v16 = vld [vmem:[%s990_s3 + $0x30] sm:$0xff]   ;;  %v727_v17 = vld [vmem:[%s990_s3 + $0x38] sm:$0xff]   ;;  %v728_v18 = vld [vmem:[#allocation5] sm:$0xff]  }
  0x2c   :  { %640 = vmatpush3.bf16.msra.mxu0 %v717_v1  ;;  %v729_v19 = vld [vmem:[#allocation5 + $0x8] sm:$0xff]   ;;  %v730_v20 = vld [vmem:[#allocation5 + $0x10] sm:$0xff]   ;;  %v731_v21 = vld [vmem:[#allocation5 + $0x18] sm:$0xff]  }
  0x2d   :  { %641 = vmatprep.subr.bf16.mxu0 %v718_v2  ;;  %v732_v22 = vld [vmem:[#allocation5 + $0x20] sm:$0xff]   ;;  %v733_v23 = vld [vmem:[#allocation5 + $0x28] sm:$0xff]   ;;  %v734_v39 = vld [vmem:[#allocation5 + $0x30] sm:$0xff]  }
  0x2e   :  { %652 = vmatpush3.bf16.msra.mxu1 %v721_v7  ;;  %v567_v24 = vld [vmem:[%s989_s2] ss:$0 sm:$0xff]  ;;  %v735_v40 = vld [vmem:[#allocation5 + $0x38] sm:$0xff]   ;;  %v737_v42 = vld [vmem:[%s994_s7 + $0x8] sm:$0xff]  }
  0x2f   :  { %653 = vmatprep.subr.bf16.mxu1 %v722_v10  ;;  %v736_v41 = vld [vmem:[%s994_s7] sm:$0xff]   ;;  %v738_v43 = vld [vmem:[%s994_s7 + $0x10] sm:$0xff]   ;;  %v739_v44 = vld [vmem:[%s994_s7 + $0x18] sm:$0xff]  }
  0x30   :  { %642 = vmatpush3.bf16.msra.mxu0 %v718_v2  ;;  %v740_v45 = vld [vmem:[%s994_s7 + $0x20] sm:$0xff]   ;;  %v741_v46 = vld [vmem:[%s994_s7 + $0x28] sm:$0xff]   ;;  %v742_v62 = vld [vmem:[%s994_s7 + $0x30] sm:$0xff]  }
  0x31   :  { %643 = vmatprep.subr.bf16.mxu0 %v719_v8  ;;  %v574_v47 = vld [vmem:[%s991_s4] ss:$0 sm:$0xff]  ;;  %v743_v63 = vld [vmem:[%s994_s7 + $0x38] sm:$0xff]  }
  0x32   :  { %654 = vmatpush3.bf16.msra.mxu1 %v722_v10  ;;  %v583_v0 = vld [vmem:[%s993_s6] ss:$0 sm:$0xff]  ;;  %s820_s6 = smov [#allocation7]  }
  0x33   :  { %655 = vmatprep.subr.bf16.mxu1 %v723_v12  ;;  %s554_s0 = sshll.u32 %s820_s6, 4  ;;  %s555_s0 = int_to_ptr.vmem [resolvable:$true] %s554_s0 }
  0x34   :  { %644 = vmatpush3.bf16.msra.mxu0 %v719_v8  ;;  %p793_p3 = scmp.lt.s32.totalorder %s555_s0, %s555_s0 }
  0x35   :  { %669 = vmatprep.subr.bf16.mxu0 %v728_v18 }
  0x36   :  { %656 = vmatpush3.bf16.msra.mxu1 %v723_v12 }
  0x37   :  { %646 = vmatmul.mubr.msk.bf16.vlgmr.msra.gmra.mrb[0].mxu0 %vm107_vm0, %v67_v13  ;;  %657 = vmatprep.subr.bf16.mxu1 %v724_v14 }
  0x38   :  { %670 = vmatpush3.bf16.msra.mxu0 %v728_v18 }
  0x39   :  { %671 = vmatprep.subr.bf16.mxu0 %v729_v19 }
  0x3a   :  { %658 = vmatpush3.bf16.msra.mxu1 %v724_v14 }
  0x3b   :  { %659 = vmatprep.subr.bf16.mxu1 %v725_v15 }
  0x3c   :  { %672 = vmatpush3.bf16.msra.mxu0 %v729_v19 }
  0x3d   :  { %673 = vmatprep.subr.bf16.mxu0 %v730_v20 }
  0x3e   :  { %660 = vmatpush3.bf16.msra.mxu1 %v725_v15  ;;  %v592_v15 = vld [vmem:[%s995_s8] ss:$0 sm:$0xff]  ;;  %s788_s8 = scalar_lea.vmem %s555_s0, 512 }
  0x3f   :  { %661 = vmatprep.subr.bf16.mxu1 %v726_v16  ;;  %p789_p2 = scmp.ne.s32.totalorder %s555_s0, %s788_s8  ;;  %p794_p4 = scmp.lt.s32.totalorder %s788_s8, %s788_s8 }
  0x40   :  { %674 = vmatpush3.bf16.msra.mxu0 %v730_v20 }
  0x41   :  { %675 = vmatprep.subr.bf16.mxu0 %v731_v21  ;;  %p795_p5 = por %p794_p4, %p793_p3 }
  0x42   :  { %662 = vmatpush3.bf16.msra.mxu1 %v726_v16 }
  0x43   :  { %663 = vmatprep.subr.bf16.mxu1 %v727_v17  ;;  %p796_p6 = pnand %p795_p5, %p789_p2 }
  0x44   :  { %676 = vmatpush3.bf16.msra.mxu0 %v731_v21 }
  0x45   :  { %677 = vmatprep.subr.bf16.mxu0 %v732_v22 }
  0x46   :  { %664 = vmatpush3.bf16.msra.mxu1 %v727_v17 }
  0x47   :  { %689 = vmatprep.subr.bf16.mxu1 %v736_v41 }
  0x48   :  { %678 = vmatpush3.bf16.msra.mxu0 %v732_v22 }
  0x49   :  { %679 = vmatprep.subr.bf16.mxu0 %v733_v23 }
  0x4c   :  { %680 = vmatpush3.bf16.msra.mxu0 %v733_v23 }
  0x4d   :  { %681 = vmatprep.subr.bf16.mxu0 %v734_v39 }
  0x50   :  { %682 = vmatpush3.bf16.msra.mxu0 %v734_v39 }
  0x51   :  { %683 = vmatprep.subr.bf16.mxu0 %v735_v40 }
  0x54   :  { %684 = vmatpush3.bf16.msra.mxu0 %v735_v40 }
 0x10a   :  { %v647_v25 = vpop.f32.mrb[0].mxu0 }
 0x10b   :  { %v157_v26 = vadd.f32 %v647_v25, %v567_v24  ;;  %v148_v27 = vpop.f32.mrb[1].mxu0 }
 0x10c   :  { %v149_v28 = vadd.f32 %v567_v24, %v148_v27  ;;  %v648_v29 = vpop.f32.mrb[2].mxu0 }
 0x10d   :  { %v160_v30 = vadd.f32 %v648_v29, %v567_v24  ;;  %v151_v31 = vpop.f32.mrb[3].mxu0  ;;  %v165_v33 = vmax.f32 %v157_v26, 0.0 }
 0x10e   :  { %v152_v32 = vadd.f32 %v567_v24, %v151_v31  ;;  %v163_v35 = vmax.f32 %v149_v28, 0.0 }
 0x10f   :  { %v166_v34 = vmax.f32 %v160_v30, 0.0 }
 0x110   :  { %v164_v36 = vmax.f32 %v152_v32, 0.0 }
 0x111   :  { %v168_v37 = vpack.c.bf16 %v166_v34, %v165_v33 }
 0x112   :  { %v167_v38 = vpack.c.bf16 %v164_v36, %v163_v35 }
 0x114   :  { %665 = vmatprep.mubr.bf16.mxu1 %v167_v38 }
 0x115   :  { %666 = vmatmul.mubr.bf16.vlgmr.msra.gmra.mrb[0].mxu1 %v168_v37 }
 0x116   :  { %690 = vmatpush3.bf16.msra.mxu1 %v736_v41 }
 0x117   :  { %691 = vmatprep.subr.bf16.mxu1 %v737_v42 }
 0x11a   :  { %692 = vmatpush3.bf16.msra.mxu1 %v737_v42 }
 0x11b   :  { %693 = vmatprep.subr.bf16.mxu1 %v738_v43 }
 0x11e   :  { %694 = vmatpush3.bf16.msra.mxu1 %v738_v43 }
 0x11f   :  { %695 = vmatprep.subr.bf16.mxu1 %v739_v44 }
 0x122   :  { %696 = vmatpush3.bf16.msra.mxu1 %v739_v44 }
 0x123   :  { %697 = vmatprep.subr.bf16.mxu1 %v740_v45 }
 0x126   :  { %698 = vmatpush3.bf16.msra.mxu1 %v740_v45 }
 0x127   :  { %699 = vmatprep.subr.bf16.mxu1 %v741_v46 }
 0x12a   :  { %700 = vmatpush3.bf16.msra.mxu1 %v741_v46 }
 0x12b   :  { %701 = vmatprep.subr.bf16.mxu1 %v742_v62 }
 0x12e   :  { %702 = vmatpush3.bf16.msra.mxu1 %v742_v62 }
 0x12f   :  { %703 = vmatprep.subr.bf16.mxu1 %v743_v63 }
 0x132   :  { %704 = vmatpush3.bf16.msra.mxu1 %v743_v63 }
 0x1e8   :  { %v667_v48 = vpop.f32.mrb[0].mxu1 }
 0x1e9   :  { %v283_v49 = vadd.f32 %v667_v48, %v574_v47  ;;  %v274_v50 = vpop.f32.mrb[1].mxu1 }
 0x1ea   :  { %v275_v51 = vadd.f32 %v574_v47, %v274_v50  ;;  %v668_v52 = vpop.f32.mrb[2].mxu1 }
 0x1eb   :  { %v286_v53 = vadd.f32 %v668_v52, %v574_v47  ;;  %v277_v54 = vpop.f32.mrb[3].mxu1  ;;  %v291_v56 = vmax.f32 %v283_v49, 0.0 }
 0x1ec   :  { %v278_v55 = vadd.f32 %v574_v47, %v277_v54  ;;  %v289_v58 = vmax.f32 %v275_v51, 0.0 }
 0x1ed   :  { %v292_v57 = vmax.f32 %v286_v53, 0.0 }
 0x1ee   :  { %v290_v59 = vmax.f32 %v278_v55, 0.0 }
 0x1ef   :  { %v294_v60 = vpack.c.bf16 %v292_v57, %v291_v56 }
 0x1f0   :  { %v293_v61 = vpack.c.bf16 %v290_v59, %v289_v58 }
 0x1f2   :  { %685 = vmatprep.mubr.bf16.mxu0 %v293_v61 }
 0x1f3   :  { %686 = vmatmul.mubr.bf16.vlgmr.msra.gmra.mrb[4].mxu0 %v294_v60 }
 0x2c6   :  { %v687_v1 = vpop.f32.mrb[4].mxu0 }
 0x2c7   :  { %v409_v2 = vadd.f32 %v687_v1, %v583_v0  ;;  %v400_v3 = vpop.f32.mrb[5].mxu0 }
 0x2c8   :  { %v401_v4 = vadd.f32 %v583_v0, %v400_v3  ;;  %v688_v5 = vpop.f32.mrb[6].mxu0 }
 0x2c9   :  { %v412_v6 = vadd.f32 %v688_v5, %v583_v0  ;;  %v403_v7 = vpop.f32.mrb[7].mxu0  ;;  %v417_v9 = vmax.f32 %v409_v2, 0.0 }
 0x2ca   :  { %v404_v8 = vadd.f32 %v583_v0, %v403_v7  ;;  %v415_v11 = vmax.f32 %v401_v4, 0.0 }
 0x2cb   :  { %v418_v10 = vmax.f32 %v412_v6, 0.0 }
 0x2cc   :  { %v416_v12 = vmax.f32 %v404_v8, 0.0 }
 0x2cd   :  { %v420_v13 = vpack.c.bf16 %v418_v10, %v417_v9 }
 0x2ce   :  { %v419_v14 = vpack.c.bf16 %v416_v12, %v415_v11 }
 0x2d0   :  { %705 = vmatprep.mubr.bf16.mxu1 %v419_v14 }
 0x2d1   :  { %706 = vmatmul.mubr.bf16.vlgmr.msra.gmra.mrb[4].mxu1 %v420_v13 }
 0x3a4   :  { %v707_v16 = vpop.f32.mrb[4].mxu1 }
 0x3a5   :  { %v535_v17 = vadd.f32 %v707_v16, %v592_v15  ;;  %v526_v18 = vpop.f32.mrb[5].mxu1 }
 0x3a6   :  { %v527_v19 = vadd.f32 %v592_v15, %v526_v18  ;;  %v708_v20 = vpop.f32.mrb[6].mxu1 }
 0x3a7   :  { %v543_v21 = vmax.f32 %v535_v17, 0.0  ;;  %v538_v22 = vadd.f32 %v708_v20, %v592_v15  ;;  %v529_v23 = vpop.f32.mrb[7].mxu1 }
 0x3a8   :  { %v541_v24 = vmax.f32 %v527_v19, 0.0  ;;  %v530_v25 = vadd.f32 %v592_v15, %v529_v23 }
 0x3a9   :  { %547 = vst.msk [vmem:[#allocation7 + $0x10] sm:$0xff] %vm107_vm0, %v543_v21  ;;  %v544_v26 = vmax.f32 %v538_v22, 0.0 }
 0x3aa   :  { %545 = vst.msk [vmem:[#allocation7] sm:$0xff] %vm107_vm0, %v541_v24  ;;  %v542_v27 = vmax.f32 %v530_v25, 0.0 }
 0x3ab   :  { %548 = vst.msk [vmem:[#allocation7 + $0x18] sm:$0xff] %vm107_vm0, %v544_v26 }
 0x3ac   :  { %546 = vst.msk [vmem:[#allocation7 + $0x8] sm:$0xff] %vm107_vm0, %v542_v27 }
 0x3ad   :  { %799 = shalt.err (!%p796_p6)
}
 0x3ae   :  { %s800_s10 = scalar_lea.hbm %s996_s9, 512 }
 0x3af   :  { %p801_p7 = scmp.ne.s32.totalorder %s996_s9, %s800_s10  ;;  %p804_p8 = scmp.lt.u32.totalorder %s800_s10, %s996_s9 }
 0x3b1   :  { %p806_p9 = pnand %p804_p8, %p801_p7 }
 0x3b3   :  { %809 = shalt.err (!%p806_p9)
}
 0x3b4   :  { %s821_s15 = smov 128   ;;  %s822_s16 = smov 8  }
 0x3b5   :  { %560 = dma.vmem_to_hbm [thread:$0]  %s555_s0, 512, %s996_s9, [#allocation4], %s821_s15, %s821_s15, %s822_s16  }
 0x3b6   :  { %814 = dma.done.wait [#allocation4], 512  }
 0x3b7   :  { %815 = vsyncadd [#allocation4], 4294966784 }
 0x3b8   :  { %564 = vsyncpa [#allocation3], 1 }
 0x3b9   :  { %565 = vsyncpa [#allocation6], 1 }
 0x3ba   :  { %566 = vsyncpa [#allocation4], 1 }

</bundles_post_ra>
